<compile_context>
chip_gen: v6e
topology: v6e:2x2x1
jax: 0.10.0
libtpu: 0.0.40
codegen_flags: <defaults>
</compile_context>

<pallas_src>
import functools

import jax
import jax.numpy as jnp
from jax.experimental import pallas as pl
from jax.experimental.pallas import tpu as pltpu


def _round_up(x, m):
    return ((x + m - 1) // m) * m


def _pad_to(a, shape):
    pads = [(0, t - s) for s, t in zip(a.shape, shape)]
    return jnp.pad(a, pads)


def _actor_kernel(x_ref, w1_ref, b1_ref, w2_ref, b2_ref, w3_ref, b3_ref,
                  o_ref, *, max_action, action_dim):
    # In-kernel f32 -> bf16 cast (rides the VPU slot under the MXU).
    x = x_ref[...].astype(jnp.bfloat16)
    # Layer 1: Linear(state_dim, H1) + ReLU  (bf16 MXU, f32 accumulate)
    h1 = jnp.dot(x, w1_ref[...],
                 preferred_element_type=jnp.float32) + b1_ref[...]
    h1 = jnp.maximum(h1, 0.0).astype(jnp.bfloat16)
    # Layer 2: Linear(H1, H2) + ReLU
    h2 = jnp.dot(h1, w2_ref[...],
                 preferred_element_type=jnp.float32) + b2_ref[...]
    h2 = jnp.maximum(h2, 0.0).astype(jnp.bfloat16)
    # Layer 3: Linear(H2, A) + Tanh, scaled by max_action.
    # Matmul uses the 128-padded weight for MXU friendliness, then slice back
    # to the true action_dim before tanh / store (narrow, unpadded output).
    y = jnp.dot(h2, w3_ref[...],
                preferred_element_type=jnp.float32) + b3_ref[...]
    y = y[:, :action_dim]
    o_ref[...] = (max_action * jnp.tanh(y)).astype(o_ref.dtype)


def init_actor_params(key, state_dim, action_dim):
    """PyTorch-Linear-style init (U[-1/sqrt(fan_in), 1/sqrt(fan_in)]).
    Weights stored as (in, out); biases as (1, out). All f32."""
    dims = [(state_dim, 400), (400, 300), (300, action_dim)]
    params = {}
    for idx, (fan_in, fan_out) in enumerate(dims, start=1):
        key, kw, kb = jax.random.split(key, 3)
        bound = 1.0 / jnp.sqrt(fan_in)
        params[f"w{idx}"] = jax.random.uniform(
            kw, (fan_in, fan_out), jnp.float32, -bound, bound)
        params[f"b{idx}"] = jax.random.uniform(
            kb, (1, fan_out), jnp.float32, -bound, bound)
    return params


def prepare_actor_params(params):
    """One-time transform: zero-pad hidden/output dims to 128-aligned sizes
    and cast weights to bf16 for the MXU (biases stay f32)."""
    w1, b1 = params["w1"], params["b1"]
    w2, b2 = params["w2"], params["b2"]
    w3, b3 = params["w3"], params["b3"]
    S, H1 = w1.shape
    H2 = w2.shape[1]
    A = w3.shape[1]
    H1p = _round_up(H1, 128)
    H2p = _round_up(H2, 128)
    Ap = _round_up(A, 128)
    return {
        "w1": _pad_to(w1, (S, H1p)).astype(jnp.bfloat16),
        "b1": _pad_to(b1, (1, H1p)).astype(jnp.float32),
        "w2": _pad_to(w2, (H1p, H2p)).astype(jnp.bfloat16),
        "b2": _pad_to(b2, (1, H2p)).astype(jnp.float32),
        "w3": _pad_to(w3, (H2p, Ap)).astype(jnp.bfloat16),
        "b3": _pad_to(b3, (1, Ap)).astype(jnp.float32),
        "action_dim": A,
    }


def actor_forward(state, prepared, max_action, *, block_b=1024):
    """state: (B, state_dim) f32. prepared: output of prepare_actor_params."""
    w1, b1 = prepared["w1"], prepared["b1"]
    w2, b2 = prepared["w2"], prepared["b2"]
    w3, b3 = prepared["w3"], prepared["b3"]
    A = prepared["action_dim"]

    B, S = state.shape
    H1p, H2p, Ap = w1.shape[1], w2.shape[1], w3.shape[1]

    # Tiny sublane pad only when B is not a multiple of 8 (keeps state f32;
    # no full-batch copy needed for large, 8-aligned batches).
    Bp = _round_up(B, 8)
    x = state
    if Bp != B:
        x = jnp.pad(x, ((0, Bp - B), (0, 0)))

    # Batch tile: large enough to amortize per-step pipeline overhead, but
    # keep >= 2 grid steps for big batches so v7x megacore can split them.
    TB = min(block_b, Bp)
    if Bp >= 512:
        TB = min(TB, _round_up(pl.cdiv(Bp, 2), 256))
    TB = max(8, _round_up(TB, 8))
    grid = (pl.cdiv(Bp, TB),)

    flops = 2 * Bp * (S * H1p + H1p * H2p + H2p * Ap)
    bytes_accessed = (Bp * S * 4                                  # f32 state
                      + (w1.size + w2.size + w3.size) * 2         # bf16 weights
                      + (b1.size + b2.size + b3.size) * 4         # f32 biases
                      + Bp * A * 4)                               # narrow f32 out
    cost = pl.CostEstimate(flops=flops,
                           transcendentals=Bp * A,
                           bytes_accessed=bytes_accessed)

    kernel = functools.partial(_actor_kernel,
                               max_action=float(max_action),
                               action_dim=A)
    out = pl.pallas_call(
        kernel,
        out_shape=jax.ShapeDtypeStruct((Bp, A), jnp.float32),
        grid_spec=pltpu.PrefetchScalarGridSpec(
            num_scalar_prefetch=0,
            grid=grid,
            in_specs=[
                # State: blocked along the batch axis (partial last block OK,
                # rows are independent).
                pl.BlockSpec((TB, S), lambda i: (i, 0)),
                # Weights / biases: same block every step -> VMEM-resident.
                pl.BlockSpec((S, H1p), lambda i: (0, 0)),
                pl.BlockSpec((1, H1p), lambda i: (0, 0)),
                pl.BlockSpec((H1p, H2p), lambda i: (0, 0)),
                pl.BlockSpec((1, H2p), lambda i: (0, 0)),
                pl.BlockSpec((H2p, Ap), lambda i: (0, 0)),
                pl.BlockSpec((1, Ap), lambda i: (0, 0)),
            ],
            # Narrow output: last dim equals the full array dim (action_dim),
            # so no 128-wide padded writeback.
            out_specs=pl.BlockSpec((TB, A), lambda i: (i, 0)),
        ),
        compiler_params=pltpu.CompilerParams(
            dimension_semantics=("parallel",),
            vmem_limit_bytes=32 * 1024 * 1024),
        cost_estimate=cost,
    )(x, w1, b1, w2, b2, w3, b3)

    return out if Bp == B else out[:B]


def actor_reference(state, params, max_action):
    h1 = jnp.maximum(state @ params["w1"] + params["b1"], 0.0)
    h2 = jnp.maximum(h1 @ params["w2"] + params["b2"], 0.0)
    return max_action * jnp.tanh(h2 @ params["w3"] + params["b3"])


if __name__ == "__main__":
    key = jax.random.PRNGKey(0)
    batch, state_dim, action_dim = 2, 32, 8
    max_action = 2.0

    kp, kx = jax.random.split(key)
    params = init_actor_params(kp, state_dim, action_dim)
    state = jax.random.normal(kx, (batch, state_dim), jnp.float32)

    prepared = prepare_actor_params(params)
    out = actor_forward(state, prepared, max_action)
    out = jax.block_until_ready(out)

    ref = actor_reference(state, params, max_action)
    assert out.shape == (batch, action_dim), out.shape
    max_err = jnp.max(jnp.abs(out - ref))
    # bf16 MXU operands -> loosened tolerance vs the f32 reference.
    assert max_err < 5e-2, f"max abs err {max_err}"

    print("KERNEL_OK")
</pallas_src>

<mosaic_0001>
module attributes {stable_mosaic.version = 11 : i64} {
  func.func @_actor_kernel(%arg0: i32, %arg1: memref<8x32xf32, #tpu.memory_space<vmem>>, %arg2: memref<32x512xbf16, #tpu.memory_space<vmem>>, %arg3: memref<1x512xf32, #tpu.memory_space<vmem>>, %arg4: memref<512x384xbf16, #tpu.memory_space<vmem>>, %arg5: memref<1x384xf32, #tpu.memory_space<vmem>>, %arg6: memref<384x128xbf16, #tpu.memory_space<vmem>>, %arg7: memref<1x128xf32, #tpu.memory_space<vmem>>, %arg8: memref<8x8xf32, #tpu.memory_space<vmem>>) attributes {dimension_semantics = [#tpu.dimension_semantics<parallel>], iteration_bounds = array<i64: 1>, scalar_prefetch = 0 : i64, scratch_operands = 0 : i64, tpu.core_type = #tpu.core_type<tc>, window_params = [{transform_indices = @transform_0, window_bounds = array<i64: 8, 32>}, {pipeline_mode = #tpu.pipeline_mode<synchronous>, transform_indices = @transform_1, window_bounds = array<i64: 32, 512>}, {pipeline_mode = #tpu.pipeline_mode<synchronous>, transform_indices = @transform_2, window_bounds = array<i64: 1, 512>}, {pipeline_mode = #tpu.pipeline_mode<synchronous>, transform_indices = @transform_3, window_bounds = array<i64: 512, 384>}, {pipeline_mode = #tpu.pipeline_mode<synchronous>, transform_indices = @transform_4, window_bounds = array<i64: 1, 384>}, {pipeline_mode = #tpu.pipeline_mode<synchronous>, transform_indices = @transform_5, window_bounds = array<i64: 384, 128>}, {pipeline_mode = #tpu.pipeline_mode<synchronous>, transform_indices = @transform_6, window_bounds = array<i64: 1, 128>}, {transform_indices = @transform_7, window_bounds = array<i64: 8, 8>}]} {
    %c0 = arith.constant 0 : index
    %c0_0 = arith.constant 0 : index
    %0 = vector.load %arg1[%c0, %c0_0] : memref<8x32xf32, #tpu.memory_space<vmem>>, vector<8x32xf32>
    %1 = arith.truncf %0 : vector<8x32xf32> to vector<8x32xbf16>
    %c0_1 = arith.constant 0 : index
    %c0_2 = arith.constant 0 : index
    %2 = vector.load %arg2[%c0_1, %c0_2] : memref<32x512xbf16, #tpu.memory_space<vmem>>, vector<32x512xbf16>
    %cst = arith.constant dense<0.000000e+00> : vector<8x512xf32>
    %3 = tpu.matmul %1, %2, %cst {dimension_numbers = #tpu.dot_dimension_numbers<[1], [0], [0], [1], [0, 0, 1, 1], [], []>} : vector<8x32xbf16>, vector<32x512xbf16>, vector<8x512xf32> -> vector<8x512xf32>
    %c0_3 = arith.constant 0 : index
    %c0_4 = arith.constant 0 : index
    %4 = vector.load %arg3[%c0_3, %c0_4] : memref<1x512xf32, #tpu.memory_space<vmem>>, vector<1x512xf32>
    %5 = vector.broadcast %4 : vector<1x512xf32> to vector<8x512xf32>
    %6 = arith.addf %3, %5 : vector<8x512xf32>
    %cst_5 = arith.constant 0.000000e+00 : f32
    %7 = vector.broadcast %cst_5 : f32 to vector<8x512xf32>
    %8 = arith.maximumf %6, %7 : vector<8x512xf32>
    %9 = arith.truncf %8 : vector<8x512xf32> to vector<8x512xbf16>
    %c0_6 = arith.constant 0 : index
    %c0_7 = arith.constant 0 : index
    %10 = vector.load %arg4[%c0_6, %c0_7] : memref<512x384xbf16, #tpu.memory_space<vmem>>, vector<512x384xbf16>
    %cst_8 = arith.constant dense<0.000000e+00> : vector<8x384xf32>
    %11 = tpu.matmul %9, %10, %cst_8 {dimension_numbers = #tpu.dot_dimension_numbers<[1], [0], [0], [1], [0, 0, 1, 1], [], []>} : vector<8x512xbf16>, vector<512x384xbf16>, vector<8x384xf32> -> vector<8x384xf32>
    %c0_9 = arith.constant 0 : index
    %c0_10 = arith.constant 0 : index
    %12 = vector.load %arg5[%c0_9, %c0_10] : memref<1x384xf32, #tpu.memory_space<vmem>>, vector<1x384xf32>
    %13 = vector.broadcast %12 : vector<1x384xf32> to vector<8x384xf32>
    %14 = arith.addf %11, %13 : vector<8x384xf32>
    %cst_11 = arith.constant 0.000000e+00 : f32
    %15 = vector.broadcast %cst_11 : f32 to vector<8x384xf32>
    %16 = arith.maximumf %14, %15 : vector<8x384xf32>
    %17 = arith.truncf %16 : vector<8x384xf32> to vector<8x384xbf16>
    %c0_12 = arith.constant 0 : index
    %c0_13 = arith.constant 0 : index
    %18 = vector.load %arg6[%c0_12, %c0_13] : memref<384x128xbf16, #tpu.memory_space<vmem>>, vector<384x128xbf16>
    %cst_14 = arith.constant dense<0.000000e+00> : vector<8x128xf32>
    %19 = tpu.matmul %17, %18, %cst_14 {dimension_numbers = #tpu.dot_dimension_numbers<[1], [0], [0], [1], [0, 0, 1, 1], [], []>} : vector<8x384xbf16>, vector<384x128xbf16>, vector<8x128xf32> -> vector<8x128xf32>
    %c0_15 = arith.constant 0 : index
    %c0_16 = arith.constant 0 : index
    %20 = vector.load %arg7[%c0_15, %c0_16] : memref<1x128xf32, #tpu.memory_space<vmem>>, vector<1x128xf32>
    %21 = vector.broadcast %20 : vector<1x128xf32> to vector<8x128xf32>
    %22 = arith.addf %19, %21 : vector<8x128xf32>
    %23 = vector.extract_strided_slice %22 {offsets = [0, 0], sizes = [8, 8], strides = [1, 1]} : vector<8x128xf32> to vector<8x8xf32>
    %24 = math.tanh %23 : vector<8x8xf32>
    %cst_17 = arith.constant 2.000000e+00 : f32
    %25 = vector.broadcast %cst_17 : f32 to vector<8x8xf32>
    %26 = arith.mulf %25, %24 : vector<8x8xf32>
    %c0_18 = arith.constant 0 : index
    %c0_19 = arith.constant 0 : index
    %27 = vector.load %arg8[%c0_18, %c0_19] : memref<8x8xf32, #tpu.memory_space<vmem>>, vector<8x8xf32>
    tpu.vector_store %arg8[%c0_18, %c0_19], %26 {strides = array<i32>} : memref<8x8xf32, #tpu.memory_space<vmem>>, vector<8x8xf32>,
    return
  }
  func.func @transform_0(%arg0: i32) -> (i32, i32) {
    %c0_i32 = arith.constant 0 : i32
    %c0_i32_0 = arith.constant 0 : i32
    return %arg0, %c0_i32 : i32, i32
  }
  func.func @transform_1(%arg0: i32) -> (i32, i32) {
    %c0_i32 = arith.constant 0 : i32
    %c0_i32_0 = arith.constant 0 : i32
    %c0_i32_1 = arith.constant 0 : i32
    return %c0_i32, %c0_i32_0 : i32, i32
  }
  func.func @transform_2(%arg0: i32) -> (i32, i32) {
    %c0_i32 = arith.constant 0 : i32
    %c0_i32_0 = arith.constant 0 : i32
    %c0_i32_1 = arith.constant 0 : i32
    return %c0_i32, %c0_i32_0 : i32, i32
  }
  func.func @transform_3(%arg0: i32) -> (i32, i32) {
    %c0_i32 = arith.constant 0 : i32
    %c0_i32_0 = arith.constant 0 : i32
    %c0_i32_1 = arith.constant 0 : i32
    return %c0_i32, %c0_i32_0 : i32, i32
  }
  func.func @transform_4(%arg0: i32) -> (i32, i32) {
    %c0_i32 = arith.constant 0 : i32
    %c0_i32_0 = arith.constant 0 : i32
    %c0_i32_1 = arith.constant 0 : i32
    return %c0_i32, %c0_i32_0 : i32, i32
  }
  func.func @transform_5(%arg0: i32) -> (i32, i32) {
    %c0_i32 = arith.constant 0 : i32
    %c0_i32_0 = arith.constant 0 : i32
    %c0_i32_1 = arith.constant 0 : i32
    return %c0_i32, %c0_i32_0 : i32, i32
  }
  func.func @transform_6(%arg0: i32) -> (i32, i32) {
    %c0_i32 = arith.constant 0 : i32
    %c0_i32_0 = arith.constant 0 : i32
    %c0_i32_1 = arith.constant 0 : i32
    return %c0_i32, %c0_i32_0 : i32, i32
  }
  func.func @transform_7(%arg0: i32) -> (i32, i32) {
    %c0_i32 = arith.constant 0 : i32
    %c0_i32_0 = arith.constant 0 : i32
    return %arg0, %c0_i32 : i32, i32
  }
}

</mosaic_0001>

<bundles_post_ra>
// kernel: tpu_custom_call.1
= control target key start
LH: loop header
LB: loop body
LE: loop exit
PB: predicated region body
PF: predicated region fallthrough
CT: control target
= control target key end

     0   :  { %12 = vsyncpa [#allocation3], 0  ;;  %s2023_s0 = inlined_call_operand.hbm [shape: f32[8,32], index: 0, kind: input, shape index: {}]   ;;  %s2024_s1 = inlined_call_operand.hbm [shape: bf16[32,512], index: 1, kind: input, shape index: {}]   ;;  %s2025_s2 = inlined_call_operand.hbm [shape: f32[1,512], index: 2, kind: input, shape index: {}]   ;;  %s2026_s3 = inlined_call_operand.hbm [shape: bf16[512,384], index: 3, kind: input, shape index: {}]   ;;  %s2027_s4 = inlined_call_operand.vmem [shape: f32[1,384], index: 4, kind: input, shape index: {}]   ;;  %s2028_s5 = inlined_call_operand.hbm [shape: bf16[384,128], index: 5, kind: input, shape index: {}]   ;;  %s2029_s6 = inlined_call_operand.vmem [shape: f32[1,128], index: 6, kind: input, shape index: {}]   ;;  %s2030_s7 = inlined_call_operand.hbm [shape: f32[8,8], index: 7, kind: output, shape index: {}]  }
   0x1   :  { %13 = vsyncpa [#allocation6], 0 }
   0x2   :  { %14 = vsyncpa [#allocation9], 0 }
   0x3   :  { %15 = vsyncpa [#allocation4], 0  ;;  %s1918_s24 = smov [#allocation5]  }
   0x4   :  { %s31_s25 = sshll.u32 %s1918_s24, 4  ;;  %s32_s25 = int_to_ptr.vmem [resolvable:$true] %s31_s25 }
   0x5   :  { %s1798_s26 = scalar_lea.vmem %s32_s25, 1024  ;;  %p1803_p1 = scmp.lt.s32.totalorder %s32_s25, %s32_s25 }
   0x6   :  { %p1799_p0 = scmp.ne.s32.totalorder %s32_s25, %s1798_s26  ;;  %p1804_p2 = scmp.lt.s32.totalorder %s1798_s26, %s1798_s26 }
   0x8   :  { %p1805_p3 = por %p1804_p2, %p1803_p1 }
   0xa   :  { %p1806_p4 = pnand %p1805_p3, %p1799_p0 }
   0xc   :  { %1809 = shalt.err (!%p1806_p4)
}
   0xd   :  { %s1919_s27 = smov 256   ;;  %s1920_s28 = smov 16  }
   0xe   :  { %37 = dma.hbm_to_vmem [thread:$0]  %s2024_s1, 1024, %s32_s25, [#allocation6], %s1919_s27, %s1919_s27, %s1920_s28  }
   0xf   :  { %s1921_s8 = smov [#allocation8]  }
  0x10   :  { %s53_s9 = sshll.u32 %s1921_s8, 4  ;;  %s54_s9 = int_to_ptr.vmem [resolvable:$true] %s53_s9 }
  0x11   :  { %s1818_s10 = scalar_lea.vmem %s54_s9, 12288  ;;  %p1823_p6 = scmp.lt.s32.totalorder %s54_s9, %s54_s9 }
  0x12   :  { %p1819_p5 = scmp.ne.s32.totalorder %s54_s9, %s1818_s10  ;;  %p1824_p7 = scmp.lt.s32.totalorder %s1818_s10, %s1818_s10 }
  0x14   :  { %p1825_p8 = por %p1824_p7, %p1823_p6 }
  0x16   :  { %p1826_p9 = pnand %p1825_p8, %p1819_p5 }
  0x18   :  { %1829 = shalt.err (!%p1826_p9)
}
  0x19   :  { %s1922_s11 = smov 192   ;;  %s1923_s12 = smov 12  }
  0x1a   :  { %59 = dma.hbm_to_vmem [thread:$0]  %s2026_s3, 12288, %s54_s9, [#allocation9], %s1922_s11, %s1922_s11, %s1923_s12  }
  0x1b   :  { %s1924_s15 = smov [#allocation2]   ;;  %s1925_s17 = smov [#allocation7]  }
  0x1c   :  { %s22_s16 = sshll.u32 %s1924_s15, 4  ;;  %s44_s1 = sshll.u32 %s1925_s17, 4  ;;  %s23_s16 = int_to_ptr.vmem [resolvable:$true] %s22_s16  ;;  %s45_s1 = int_to_ptr.vmem [resolvable:$true] %s44_s1 }
  0x1d   :  { %s1838_s18 = scalar_lea.vmem %s23_s16, 128  ;;  %p1843_p11 = scmp.lt.s32.totalorder %s23_s16, %s23_s16 }
  0x1e   :  { %p1839_p10 = scmp.ne.s32.totalorder %s23_s16, %s1838_s18  ;;  %p1844_p12 = scmp.lt.s32.totalorder %s1838_s18, %s1838_s18 }
  0x20   :  { %p1845_p13 = por %p1844_p12, %p1843_p11 }
  0x22   :  { %p1846_p0 = pnand %p1845_p13, %p1839_p10 }
  0x24   :  { %1849 = shalt.err (!%p1846_p0)
}
  0x25   :  { %25 = dma.hbm_to_vmem [thread:$0]  %s2023_s0, 128, %s23_s16, [#allocation3]  }
  0x26   :  { %s1858_s21 = scalar_lea.vmem %s45_s1, 64  ;;  %p1863_p2 = scmp.lt.s32.totalorder %s45_s1, %s45_s1 }
  0x27   :  { %p1859_p1 = scmp.ne.s32.totalorder %s45_s1, %s1858_s21  ;;  %p1864_p3 = scmp.lt.s32.totalorder %s1858_s21, %s1858_s21 }
  0x29   :  { %p1865_p4 = por %p1864_p3, %p1863_p2 }
  0x2b   :  { %p1866_p5 = pnand %p1865_p4, %p1859_p1 }
  0x2d   :  { %1869 = shalt.err (!%p1866_p5)
}
  0x2e   :  { %47 = dma.hbm_to_vmem [thread:$0]  %s2025_s2, 64, %s45_s1, [#allocation6]  }
  0x2f   :  { %s1926_s23 = smov [#allocation10]  }
  0x30   :  { %s67_s24 = sshll.u32 %s1926_s23, 4  ;;  %s68_s24 = int_to_ptr.vmem [resolvable:$true] %s67_s24 }
  0x31   :  { %s1878_s25 = scalar_lea.vmem %s68_s24, 3072  ;;  %p1883_p7 = scmp.lt.s32.totalorder %s68_s24, %s68_s24 }
  0x32   :  { %p1879_p6 = scmp.ne.s32.totalorder %s68_s24, %s1878_s25  ;;  %p1884_p8 = scmp.lt.s32.totalorder %s1878_s25, %s1878_s25 }
  0x34   :  { %p1885_p9 = por %p1884_p8, %p1883_p7 }
  0x36   :  { %p1886_p10 = pnand %p1885_p9, %p1879_p6 }
  0x38   :  { %1889 = shalt.err (!%p1886_p10)
}
  0x39   :  { %s1927_s0 = smov 64   ;;  %s1928_s26 = smov 4  }
  0x3a   :  { %73 = dma.hbm_to_vmem [thread:$0]  %s2028_s5, 3072, %s68_s24, [#allocation9], %s1927_s0, %s1927_s0, %s1928_s26  }
  0x3b   :  { %1910 = dma.done.wait [#allocation3], 128  }
  0x3c   :  { %1911 = vsyncadd [#allocation3], 4294967168 }
  0x3d   :  { %1912 = dma.done.wait [#allocation6], 1088  }
  0x3e   :  { %1913 = vsyncadd [#allocation6], 4294966208 }
  0x3f   :  { %1914 = dma.done.wait [#allocation9], 15360  }
  0x40   :  { %1915 = vsyncadd [#allocation9], 4294951936  ;;  %v1929_v0 = vmov 0   ;;  %v1624_v1 = vld [vmem:[#allocation5 + $0x24] ss:$16 sps:$4 sm:$0xff]   ;;  %v92_v9 = vld [vmem:[#allocation2] sm:$0xff] }
  0x41   :  { %200 = vmatprep.mubr.bf16.mxu0 %v1929_v0  ;;  %241 = vmatprep.mubr.bf16.mxu1 %v1929_v0  ;;  %v1626_v2 = vld [vmem:[#allocation5 + $0x2c] ss:$16 sps:$4 sm:$0xff]   ;;  %v1628_v3 = vld [vmem:[#allocation5 + $0x20] ss:$16 sps:$4 sm:$0xff]   ;;  %v1629_v4 = vld [vmem:[#allocation5 + $0x28] ss:$16 sps:$4 sm:$0xff]   ;;  %v93_v12 = vpack.c.bf16 %v92_v9, %v92_v9 }
  0x42   :  { %180 = vmatprep.subr.bf16.mxu0 %v1624_v1  ;;  %221 = vmatprep.subr.bf16.mxu1 %v1626_v2  ;;  %v1630_v5 = vld [vmem:[#allocation5 + $0x4] ss:$16 sps:$4 sm:$0xff]   ;;  %v1632_v6 = vld [vmem:[#allocation5 + $0xc] ss:$16 sps:$4 sm:$0xff]   ;;  %v1634_v7 = vld [vmem:[#allocation5] ss:$16 sps:$4 sm:$0xff]  }
  0x43   :  { %181 = vmatpush1.bf16.msra.mxu0 %v1628_v3  ;;  %222 = vmatpush1.bf16.msra.mxu1 %v1629_v4  ;;  %v1635_v8 = vld [vmem:[#allocation5 + $0x8] ss:$16 sps:$4 sm:$0xff]   ;;  %v1638_v11 = vld [vmem:[#allocation8 + $0xac] ss:$12 sps:$4 sm:$0xff]   ;;  %vm164_vm0 = vcmask 261120   ;;  %vm1931_vm1 = vmmov 0  }
  0x44   :  { %182 = vmatprep.subr.bf16.mxu0 %v1630_v5  ;;  %223 = vmatprep.subr.bf16.mxu1 %v1632_v6  ;;  %v1636_v10 = vld [vmem:[#allocation8 + $0xa8] ss:$12 sps:$4 sm:$0xff]   ;;  %v1641_v14 = vld [vmem:[#allocation8 + $0x22c] ss:$12 sps:$4 sm:$0xff]   ;;  %v1642_v17 = vld [vmem:[#allocation8 + $0x90] ss:$12 sps:$4 sm:$0xff]  }
  0x45   :  { %v1639_v13 = vld [vmem:[#allocation8 + $0x228] ss:$12 sps:$4 sm:$0xff]   ;;  %v1645_v18 = vld [vmem:[#allocation8 + $0x210] ss:$12 sps:$4 sm:$0xff]   ;;  %v1648_v21 = vld [vmem:[#allocation8 + $0x78] ss:$12 sps:$4 sm:$0xff]  }
  0x46   :  { %v1644_v15 = vld [vmem:[#allocation8 + $0x94] ss:$12 sps:$4 sm:$0xff]   ;;  %v1650_v19 = vld [vmem:[#allocation8 + $0x7c] ss:$12 sps:$4 sm:$0xff]   ;;  %v1651_v22 = vld [vmem:[#allocation8 + $0x1f8] ss:$12 sps:$4 sm:$0xff]  }
  0x47   :  { %183 = vmatpush1.bf16.msra.mxu0 %v1634_v7  ;;  %224 = vmatpush1.bf16.msra.mxu1 %v1635_v8  ;;  %v1647_v16 = vld [vmem:[#allocation8 + $0x214] ss:$12 sps:$4 sm:$0xff]   ;;  %v1653_v20 = vld [vmem:[#allocation8 + $0x1fc] ss:$12 sps:$4 sm:$0xff]   ;;  %v1656_v23 = vld [vmem:[#allocation8 + $0x64] ss:$12 sps:$4 sm:$0xff]  }
  0x48   :  { %915 = vmatprep.subr.bf16.mxu0 %v1638_v11  ;;  %956 = vmatprep.subr.bf16.mxu1 %v1641_v14  ;;  %v1659_v24 = vld [vmem:[#allocation8 + $0x1e4] ss:$12 sps:$4 sm:$0xff]   ;;  %v1654_v25 = vld [vmem:[#allocation8 + $0x60] ss:$12 sps:$4 sm:$0xff]   ;;  %v1660_v29 = vld [vmem:[#allocation8 + $0x48] ss:$12 sps:$4 sm:$0xff]  }
  0x49   :  { %v1657_v26 = vld [vmem:[#allocation8 + $0x1e0] ss:$12 sps:$4 sm:$0xff]   ;;  %v1663_v30 = vld [vmem:[#allocation8 + $0x1c8] ss:$12 sps:$4 sm:$0xff]   ;;  %v1666_v33 = vld [vmem:[#allocation8 + $0x30] ss:$12 sps:$4 sm:$0xff]  }
  0x4a   :  { %1391 = vmatmul.mubr.msk.bf16.vlgmr.msra.gmra.mxu0 %vm164_vm0, %v93_v12  ;;  %1392 = vmatmul.mubr.msk.bf16.vlgmr.msra.gmra.mxu1 %vm164_vm0, %v93_v12  ;;  %v1662_v27 = vld [vmem:[#allocation8 + $0x4c] ss:$12 sps:$4 sm:$0xff]   ;;  %v1668_v31 = vld [vmem:[#allocation8 + $0x34] ss:$12 sps:$4 sm:$0xff]   ;;  %v1669_v34 = vld [vmem:[#allocation8 + $0x1b0] ss:$12 sps:$4 sm:$0xff]  }
  0x4b   :  { %916 = vmatpush1.bf16.msra.mxu0 %v1636_v10  ;;  %957 = vmatpush1.bf16.msra.mxu1 %v1639_v13  ;;  %v1665_v28 = vld [vmem:[#allocation8 + $0x1cc] ss:$12 sps:$4 sm:$0xff]   ;;  %v1671_v32 = vld [vmem:[#allocation8 + $0x1b4] ss:$12 sps:$4 sm:$0xff]   ;;  %v1674_v35 = vld [vmem:[#allocation8 + $0x1c] ss:$12 sps:$4 sm:$0xff]   ;;  %v104_v13 = vlaneseq }
  0x4c   :  { %917 = vmatprep.subr.bf16.mxu0 %v1644_v15  ;;  %958 = vmatprep.subr.bf16.mxu1 %v1647_v16  ;;  %v1677_v36 = vld [vmem:[#allocation8 + $0x19c] ss:$12 sps:$4 sm:$0xff]   ;;  %v1672_v37 = vld [vmem:[#allocation8 + $0x18] ss:$12 sps:$4 sm:$0xff]   ;;  %v1678_v41 = vld [vmem:[#allocation8] ss:$12 sps:$4 sm:$0xff]  }
  0x4d   :  { %v1675_v38 = vld [vmem:[#allocation8 + $0x198] ss:$12 sps:$4 sm:$0xff]   ;;  %v1681_v42 = vld [vmem:[#allocation8 + $0x180] ss:$12 sps:$4 sm:$0xff]   ;;  %v1684_v45 = vld [vmem:[#allocation8 + $0x168] ss:$12 sps:$4 sm:$0xff]  }
  0x4e   :  { %v1680_v39 = vld [vmem:[#allocation8 + $0x4] ss:$12 sps:$4 sm:$0xff]   ;;  %v1686_v43 = vld [vmem:[#allocation8 + $0x16c] ss:$12 sps:$4 sm:$0xff]   ;;  %v1687_v46 = vld [vmem:[#allocation8 + $0x2e8] ss:$12 sps:$4 sm:$0xff]  }
  0x4f   :  { %918 = vmatpush1.bf16.msra.mxu0 %v1642_v17  ;;  %959 = vmatpush1.bf16.msra.mxu1 %v1645_v18  ;;  %v1683_v40 = vld [vmem:[#allocation8 + $0x184] ss:$12 sps:$4 sm:$0xff]   ;;  %v1689_v44 = vld [vmem:[#allocation8 + $0x2ec] ss:$12 sps:$4 sm:$0xff]   ;;  %v1692_v47 = vld [vmem:[#allocation8 + $0x154] ss:$12 sps:$4 sm:$0xff]  }
  0x50   :  { %919 = vmatprep.subr.bf16.mxu0 %v1650_v19  ;;  %960 = vmatprep.subr.bf16.mxu1 %v1653_v20  ;;  %v1695_v48 = vld [vmem:[#allocation8 + $0x2d4] ss:$12 sps:$4 sm:$0xff]   ;;  %v1690_v49 = vld [vmem:[#allocation8 + $0x150] ss:$12 sps:$4 sm:$0xff]   ;;  %v1696_v53 = vld [vmem:[#allocation8 + $0x138] ss:$12 sps:$4 sm:$0xff]  }
  0x51   :  { %v1693_v50 = vld [vmem:[#allocation8 + $0x2d0] ss:$12 sps:$4 sm:$0xff]   ;;  %v1699_v54 = vld [vmem:[#allocation8 + $0x2b8] ss:$12 sps:$4 sm:$0xff]   ;;  %v1702_v57 = vld [vmem:[#allocation8 + $0x120] ss:$12 sps:$4 sm:$0xff]  }
  0x52   :  { %v1698_v51 = vld [vmem:[#allocation8 + $0x13c] ss:$12 sps:$4 sm:$0xff]   ;;  %v1704_v55 = vld [vmem:[#allocation8 + $0x124] ss:$12 sps:$4 sm:$0xff]   ;;  %v1705_v58 = vld [vmem:[#allocation8 + $0x2a0] ss:$12 sps:$4 sm:$0xff]  }
  0x53   :  { %920 = vmatpush1.bf16.msra.mxu0 %v1648_v21  ;;  %961 = vmatpush1.bf16.msra.mxu1 %v1651_v22  ;;  %v1701_v52 = vld [vmem:[#allocation8 + $0x2bc] ss:$12 sps:$4 sm:$0xff]   ;;  %v1707_v56 = vld [vmem:[#allocation8 + $0x2a4] ss:$12 sps:$4 sm:$0xff]   ;;  %v1710_v59 = vld [vmem:[#allocation8 + $0x10c] ss:$12 sps:$4 sm:$0xff]  }
  0x54   :  { %921 = vmatprep.subr.bf16.mxu0 %v1656_v23  ;;  %962 = vmatprep.subr.bf16.mxu1 %v1659_v24  ;;  %v1713_v60 = vld [vmem:[#allocation8 + $0x28c] ss:$12 sps:$4 sm:$0xff]   ;;  %v1708_v61 = vld [vmem:[#allocation8 + $0x108] ss:$12 sps:$4 sm:$0xff]   ;;  %v1714_v1 = vld [vmem:[#allocation8 + $0xf0] ss:$12 sps:$4 sm:$0xff]  }
  0x55   :  { %v1711_v62 = vld [vmem:[#allocation8 + $0x288] ss:$12 sps:$4 sm:$0xff]   ;;  %v1717_v2 = vld [vmem:[#allocation8 + $0x270] ss:$12 sps:$4 sm:$0xff]   ;;  %v1720_v5 = vld [vmem:[#allocation8 + $0xd8] ss:$12 sps:$4 sm:$0xff]  }
  0x56   :  { %v1716_v63 = vld [vmem:[#allocation8 + $0xf4] ss:$12 sps:$4 sm:$0xff]   ;;  %v1722_v3 = vld [vmem:[#allocation8 + $0xdc] ss:$12 sps:$4 sm:$0xff]   ;;  %v1723_v6 = vld [vmem:[#allocation8 + $0x258] ss:$12 sps:$4 sm:$0xff]  }
  0x57   :  { %922 = vmatpush1.bf16.msra.mxu0 %v1654_v25  ;;  %963 = vmatpush1.bf16.msra.mxu1 %v1657_v26  ;;  %v1719_v0 = vld [vmem:[#allocation8 + $0x274] ss:$12 sps:$4 sm:$0xff]   ;;  %v1725_v4 = vld [vmem:[#allocation8 + $0x25c] ss:$12 sps:$4 sm:$0xff]   ;;  %v1728_v7 = vld [vmem:[#allocation8 + $0xc4] ss:$12 sps:$4 sm:$0xff]  }
  0x58   :  { %923 = vmatprep.subr.bf16.mxu0 %v1662_v27  ;;  %964 = vmatprep.subr.bf16.mxu1 %v1665_v28  ;;  %v1731_v8 = vld [vmem:[#allocation8 + $0x244] ss:$12 sps:$4 sm:$0xff]   ;;  %v1726_v9 = vld [vmem:[#allocation8 + $0xc0] ss:$12 sps:$4 sm:$0xff]   ;;  %v1988_v14 = vshrl.u32 %v104_v13, 7  ;;  %s1932_s30 = smov [#allocation11]  }
  0x59   :  { %v1729_v10 = vld [vmem:[#allocation8 + $0x240] ss:$12 sps:$4 sm:$0xff]   ;;  %v1732_v11 = vld [vmem:[#allocation8 + $0x170] ss:$12 sps:$4 sm:$0xff]   ;;  %s1372_s8 = sshll.u32 %s1932_s30, 4  ;;  %vm1364_vm2 = vcmask 64512   ;;  %s1373_s8 = int_to_ptr.vmem [resolvable:$true] %s1372_s8 }
  0x5a   :  { %v1733_v12 = vld [vmem:[#allocation8 + $0x2f0] ss:$12 sps:$4 sm:$0xff]   ;;  %v106_v15 = vsub.s32 0, %v1988_v14  ;;  %v114_v16 = vsub.s32 2, %v1988_v14  ;;  %v110_v18 = vsub.s32 1, %v1988_v14  ;;  %v118_v19 = vsub.s32 3, %v1988_v14  ;;  %p1895_p12 = scmp.lt.s32.totalorder %s1373_s8, %s1373_s8 }
  0x5b   :  { %924 = vmatpush1.bf16.msra.mxu0 %v1660_v29  ;;  %965 = vmatpush1.bf16.msra.mxu1 %v1663_v30  ;;  %v102_v17 = vld [vmem:[#allocation7] sm:$0xf]  ;;  %v1767_v13 = vld [vmem:[#allocation10 + $0x30] sm:$0xff]   ;;  %s1890_s9 = scalar_lea.vmem %s1373_s8, 128 }
  0x5c   :  { %925 = vmatprep.subr.bf16.mxu0 %v1668_v31  ;;  %966 = vmatprep.subr.bf16.mxu1 %v1671_v32  ;;  %v107_v20 = vrot.slane %v102_v17, %v106_v15  ;;  %v115_v21 = vrot.slane %v102_v17, %v114_v16  ;;  %v111_v22 = vrot.slane %v102_v17, %v110_v18  ;;  %v1489_v14 = vld [vmem:[%s2029_s6] ss:$0 sm:$0xff]  ;;  %p1891_p11 = scmp.ne.s32.totalorder %s1373_s8, %s1890_s9  ;;  %p1896_p13 = scmp.lt.s32.totalorder %s1890_s9, %s1890_s9 }
  0x5d   :  { %v119_v23 = vrot.slane %v102_v17, %v118_v19  ;;  %v1768_v17 = vld [vmem:[#allocation10 + $0x68] sm:$0xff]  }
  0x5e   :  { %v1769_v19 = vld [vmem:[#allocation10 + $0x28] sm:$0xff]   ;;  %p1897_p0 = por %p1896_p13, %p1895_p12 }
  0x5f   :  { %926 = vmatpush1.bf16.msra.mxu0 %v1666_v33  ;;  %967 = vmatpush1.bf16.msra.mxu1 %v1669_v34 }
  0x60   :  { %927 = vmatprep.subr.bf16.mxu0 %v1674_v35  ;;  %968 = vmatprep.subr.bf16.mxu1 %v1677_v36  ;;  %p1898_p1 = pnand %p1897_p0, %p1891_p11 }
  0x63   :  { %928 = vmatpush1.bf16.msra.mxu0 %v1672_v37  ;;  %969 = vmatpush1.bf16.msra.mxu1 %v1675_v38 }
  0x64   :  { %929 = vmatprep.subr.bf16.mxu0 %v1680_v39  ;;  %970 = vmatprep.subr.bf16.mxu1 %v1683_v40 }
  0x67   :  { %930 = vmatpush1.bf16.msra.mxu0 %v1678_v41  ;;  %971 = vmatpush1.bf16.msra.mxu1 %v1681_v42 }
  0x68   :  { %931 = vmatprep.subr.bf16.mxu0 %v1686_v43  ;;  %972 = vmatprep.subr.bf16.mxu1 %v1689_v44  ;;  %v1734_v43 = vld [vmem:[#allocation8 + $0xb0] ss:$12 sps:$4 sm:$0xff]  }
  0x69   :  { %v1735_v44 = vld [vmem:[#allocation8 + $0x230] ss:$12 sps:$4 sm:$0xff]  }
  0x6b   :  { %932 = vmatpush2.bf16.msra.mxu0 %v1684_v45  ;;  %973 = vmatpush2.bf16.msra.mxu1 %v1687_v46  ;;  %v1736_v46 = vld [vmem:[#allocation8 + $0x158] ss:$12 sps:$4 sm:$0xff]  }
  0x6c   :  { %933 = vmatprep.subr.bf16.mxu0 %v1692_v47  ;;  %974 = vmatprep.subr.bf16.mxu1 %v1695_v48  ;;  %v1737_v47 = vld [vmem:[#allocation8 + $0x2d8] ss:$12 sps:$4 sm:$0xff]  }
  0x6d   :  { %v1738_v48 = vld [vmem:[#allocation8 + $0x98] ss:$12 sps:$4 sm:$0xff]  }
  0x6f   :  { %934 = vmatpush2.bf16.msra.mxu0 %v1690_v49  ;;  %975 = vmatpush2.bf16.msra.mxu1 %v1693_v50  ;;  %v1739_v49 = vld [vmem:[#allocation8 + $0x218] ss:$12 sps:$4 sm:$0xff]   ;;  %v1740_v50 = vld [vmem:[#allocation8 + $0x140] ss:$12 sps:$4 sm:$0xff]  }
  0x70   :  { %935 = vmatprep.subr.bf16.mxu0 %v1698_v51  ;;  %976 = vmatprep.subr.bf16.mxu1 %v1701_v52  ;;  %v1741_v51 = vld [vmem:[#allocation8 + $0x2c0] ss:$12 sps:$4 sm:$0xff]  }
  0x71   :  { %v1742_v52 = vld [vmem:[#allocation8 + $0x80] ss:$12 sps:$4 sm:$0xff]  }
  0x73   :  { %936 = vmatpush2.bf16.msra.mxu0 %v1696_v53  ;;  %977 = vmatpush2.bf16.msra.mxu1 %v1699_v54  ;;  %v1743_v53 = vld [vmem:[#allocation8 + $0x200] ss:$12 sps:$4 sm:$0xff]   ;;  %v1744_v54 = vld [vmem:[#allocation8 + $0x128] ss:$12 sps:$4 sm:$0xff]  }
  0x74   :  { %937 = vmatprep.subr.bf16.mxu0 %v1704_v55  ;;  %978 = vmatprep.subr.bf16.mxu1 %v1707_v56  ;;  %v1745_v55 = vld [vmem:[#allocation8 + $0x2a8] ss:$12 sps:$4 sm:$0xff]  }
  0x75   :  { %v1746_v56 = vld [vmem:[#allocation8 + $0x68] ss:$12 sps:$4 sm:$0xff]  }
  0x77   :  { %938 = vmatpush2.bf16.msra.mxu0 %v1702_v57  ;;  %979 = vmatpush2.bf16.msra.mxu1 %v1705_v58  ;;  %v1747_v57 = vld [vmem:[#allocation8 + $0x1e8] ss:$12 sps:$4 sm:$0xff]   ;;  %v1748_v58 = vld [vmem:[#allocation8 + $0x110] ss:$12 sps:$4 sm:$0xff]  }
  0x78   :  { %939 = vmatprep.subr.bf16.mxu0 %v1710_v59  ;;  %980 = vmatprep.subr.bf16.mxu1 %v1713_v60  ;;  %v1749_v59 = vld [vmem:[#allocation8 + $0x290] ss:$12 sps:$4 sm:$0xff]  }
  0x79   :  { %v1750_v60 = vld [vmem:[#allocation8 + $0x50] ss:$12 sps:$4 sm:$0xff]  }
  0x7b   :  { %940 = vmatpush2.bf16.msra.mxu0 %v1708_v61  ;;  %981 = vmatpush2.bf16.msra.mxu1 %v1711_v62  ;;  %v1751_v61 = vld [vmem:[#allocation8 + $0x1d0] ss:$12 sps:$4 sm:$0xff]   ;;  %v1752_v62 = vld [vmem:[#allocation8 + $0xf8] ss:$12 sps:$4 sm:$0xff]  }
  0x7c   :  { %941 = vmatprep.subr.bf16.mxu0 %v1716_v63  ;;  %982 = vmatprep.subr.bf16.mxu1 %v1719_v0  ;;  %v1753_v63 = vld [vmem:[#allocation8 + $0x278] ss:$12 sps:$4 sm:$0xff]  }
  0x7d   :  { %v1754_v0 = vld [vmem:[#allocation8 + $0x38] ss:$12 sps:$4 sm:$0xff]  }
  0x7f   :  { %942 = vmatpush2.bf16.msra.mxu0 %v1714_v1  ;;  %983 = vmatpush2.bf16.msra.mxu1 %v1717_v2  ;;  %v1755_v1 = vld [vmem:[#allocation8 + $0x1b8] ss:$12 sps:$4 sm:$0xff]   ;;  %v1756_v2 = vld [vmem:[#allocation8 + $0xe0] ss:$12 sps:$4 sm:$0xff]  }
  0x80   :  { %943 = vmatprep.subr.bf16.mxu0 %v1722_v3  ;;  %984 = vmatprep.subr.bf16.mxu1 %v1725_v4  ;;  %v1757_v3 = vld [vmem:[#allocation8 + $0x260] ss:$12 sps:$4 sm:$0xff]  }
  0x81   :  { %v1758_v4 = vld [vmem:[#allocation8 + $0x20] ss:$12 sps:$4 sm:$0xff]  }
  0x83   :  { %944 = vmatpush2.bf16.msra.mxu0 %v1720_v5  ;;  %985 = vmatpush2.bf16.msra.mxu1 %v1723_v6  ;;  %v1759_v5 = vld [vmem:[#allocation8 + $0x1a0] ss:$12 sps:$4 sm:$0xff]   ;;  %v1760_v6 = vld [vmem:[#allocation8 + $0xc8] ss:$12 sps:$4 sm:$0xff]  }
  0x84   :  { %945 = vmatprep.subr.bf16.mxu0 %v1728_v7  ;;  %986 = vmatprep.subr.bf16.mxu1 %v1731_v8  ;;  %v1761_v7 = vld [vmem:[#allocation8 + $0x248] ss:$12 sps:$4 sm:$0xff]  }
  0x85   :  { %v1762_v8 = vld [vmem:[#allocation8 + $0x8] ss:$12 sps:$4 sm:$0xff]  }
  0x87   :  { %946 = vmatpush2.bf16.msra.mxu0 %v1726_v9  ;;  %987 = vmatpush2.bf16.msra.mxu1 %v1729_v10  ;;  %v1763_v9 = vld [vmem:[#allocation8 + $0x188] ss:$12 sps:$4 sm:$0xff]   ;;  %v1764_v10 = vld [vmem:[#allocation10 + $0x78] sm:$0xff]  }
  0x88   :  { %1514 = vmatprep.subr.bf16.mxu0 %v1732_v11  ;;  %1536 = vmatprep.subr.bf16.mxu1 %v1733_v12  ;;  %v1765_v11 = vld [vmem:[#allocation10 + $0x38] sm:$0xff]   ;;  %v1766_v12 = vld [vmem:[#allocation10 + $0x70] sm:$0xff]  }
 0x10a   :  { %v202_v24 = vpop.f32.mrf.mxu0  ;;  %v243_v25 = vpop.f32.mrf.mxu1 }
 0x10b   :  { %v203_v26 = vadd.f32 %v202_v24, %v107_v20  ;;  %v244_v27 = vadd.f32 %v243_v25, %v115_v21  ;;  %v1770_v20 = vld [vmem:[#allocation10 + $0x60] sm:$0xff]   ;;  %v1774_v24 = vld [vmem:[#allocation10 + $0x50] sm:$0xff]  }
 0x10c   :  { %v204_v28 = vpop.f32.mrf.mxu0  ;;  %v245_v29 = vpop.f32.mrf.mxu1  ;;  %v1771_v21 = vld [vmem:[#allocation10 + $0x20] sm:$0xff]   ;;  %v1775_v25 = vld [vmem:[#allocation10 + $0x10] sm:$0xff]  }
 0x10d   :  { %v252_v30 = vmax.f32 %v244_v27, 0.0  ;;  %v205_v31 = vadd.f32 %v204_v28, %v111_v22  ;;  %v246_v32 = vadd.f32 %v245_v29, %v119_v23  ;;  %v250_v33 = vmax.f32 %v203_v26, 0.0  ;;  %v1772_v22 = vld [vmem:[#allocation10 + $0x58] sm:$0xff]   ;;  %v1776_v26 = vld [vmem:[#allocation10 + $0x48] sm:$0xff]   ;;  %v1778_v28 = vld [vmem:[#allocation10 + $0x40] sm:$0xff]  }
 0x10e   :  { %v206_v34 = vpop.f32.mrf.mxu0  ;;  %v247_v35 = vpop.f32.mrf.mxu1  ;;  %v1773_v23 = vld [vmem:[#allocation10 + $0x18] sm:$0xff]   ;;  %v1777_v27 = vld [vmem:[#allocation10 + $0x8] sm:$0xff]   ;;  %v1779_v29 = vld [vmem:[#allocation10] sm:$0xff]  }
 0x10f   :  { %v251_v36 = vmax.f32 %v205_v31, 0.0  ;;  %v253_v37 = vmax.f32 %v246_v32, 0.0  ;;  %v2000_v38 = vpack.c.bf16 %v252_v30, %v252_v30  ;;  %v2002_v45 = vpack.c.bf16 %v250_v33, %v250_v33  ;;  %v1780_v30 = vld [vmem:[#allocation10 + $0xb8] sm:$0xff]   ;;  %v1781_v32 = vld [vmem:[#allocation10 + $0xb0] sm:$0xff]   ;;  %v1782_v33 = vld [vmem:[#allocation10 + $0xa8] sm:$0xff]  }
 0x110   :  { %v207_v39 = vpop.f32.mrf.mxu0  ;;  %v248_v40 = vpop.f32.mrf.mxu1  ;;  %v1930_v31 = vmov 0.0   ;;  %v1783_v34 = vld [vmem:[#allocation10 + $0xa0] sm:$0xff]   ;;  %v1784_v35 = vld [vmem:[#allocation10 + $0x98] sm:$0xff]  }
 0x111   :  { %v255_v41 = vpack.c.bf16 %v251_v36, %v251_v36  ;;  %v257_v42 = vpack.c.bf16 %v253_v37, %v253_v37  ;;  %v1785_v36 = vld [vmem:[#allocation10 + $0x90] sm:$0xff]   ;;  %v1786_v37 = vld [vmem:[#allocation10 + $0x88] sm:$0xff]  }
 0x112   :  { %v386_v39 = vld [vmem:[%s2027_s4] sm:$0x7] }
 0x113   :  { %947 = vmatprep.mubr.bf16.mxu0 %v255_v41  ;;  %988 = vmatprep.mubr.bf16.mxu1 %v257_v42  ;;  %v391_v40 = vrot.slane %v386_v39, %v106_v15 }
 0x114   :  { %948 = vmatmul.mubr.bf16.vlgmr.msra.gmra.mxu0 %v2002_v45  ;;  %989 = vmatmul.mubr.bf16.vlgmr.msra.gmra.mxu1 %v2000_v38 }
 0x115   :  { %1515 = vmatpush3.bf16.msra.mxu0 %v1734_v43  ;;  %1537 = vmatpush3.bf16.msra.mxu1 %v1735_v44 }
 0x116   :  { %1029 = vmatprep.mubr.bf16.mxu0 %v255_v41  ;;  %1069 = vmatprep.mubr.bf16.mxu1 %v257_v42  ;;  %v395_v41 = vrot.slane %v386_v39, %v110_v18 }
 0x117   :  { %1516 = vmatprep.subr.bf16.mxu0 %v1736_v46  ;;  %1538 = vmatprep.subr.bf16.mxu1 %v1737_v47 }
 0x119   :  { %1517 = vmatpush3.bf16.msra.mxu0 %v1738_v48  ;;  %1539 = vmatpush3.bf16.msra.mxu1 %v1739_v49 }
 0x11a   :  { %1518 = vmatprep.subr.bf16.mxu0 %v1740_v50  ;;  %1540 = vmatprep.subr.bf16.mxu1 %v1741_v51 }
 0x11d   :  { %1519 = vmatpush3.bf16.msra.mxu0 %v1742_v52  ;;  %1541 = vmatpush3.bf16.msra.mxu1 %v1743_v53 }
 0x11e   :  { %1520 = vmatprep.subr.bf16.mxu0 %v1744_v54  ;;  %1542 = vmatprep.subr.bf16.mxu1 %v1745_v55 }
 0x121   :  { %1521 = vmatpush3.bf16.msra.mxu0 %v1746_v56  ;;  %1543 = vmatpush3.bf16.msra.mxu1 %v1747_v57 }
 0x122   :  { %1522 = vmatprep.subr.bf16.mxu0 %v1748_v58  ;;  %1544 = vmatprep.subr.bf16.mxu1 %v1749_v59  ;;  %v399_v58 = vrot.slane %v386_v39, %v114_v16 }
 0x125   :  { %1523 = vmatpush3.bf16.msra.mxu0 %v1750_v60  ;;  %1545 = vmatpush3.bf16.msra.mxu1 %v1751_v61 }
 0x126   :  { %1524 = vmatprep.subr.bf16.mxu0 %v1752_v62  ;;  %1546 = vmatprep.subr.bf16.mxu1 %v1753_v63 }
 0x129   :  { %1525 = vmatpush3.bf16.msra.mxu0 %v1754_v0  ;;  %1547 = vmatpush3.bf16.msra.mxu1 %v1755_v1 }
 0x12a   :  { %1526 = vmatprep.subr.bf16.mxu0 %v1756_v2  ;;  %1548 = vmatprep.subr.bf16.mxu1 %v1757_v3 }
 0x12d   :  { %1527 = vmatpush3.bf16.msra.mxu0 %v1758_v4  ;;  %1549 = vmatpush3.bf16.msra.mxu1 %v1759_v5 }
 0x12e   :  { %1528 = vmatprep.subr.bf16.mxu0 %v1760_v6  ;;  %1550 = vmatprep.subr.bf16.mxu1 %v1761_v7 }
 0x131   :  { %1529 = vmatpush3.bf16.msra.mxu0 %v1762_v8  ;;  %1551 = vmatpush3.bf16.msra.mxu1 %v1763_v9 }
 0x132   :  { %1558 = vmatprep.subr.bf16.mxu0 %v1764_v10  ;;  %1589 = vmatprep.subr.bf16.mxu1 %v1930_v31 }
 0x134   :  { %1030 = vmatmul.mubr.bf16.vlgmr.msra.gmra.mxu0 %v2002_v45  ;;  %1070 = vmatmul.mubr.bf16.vlgmr.msra.gmra.mxu1 %v2000_v38  ;;  %v1787_v38 = vld [vmem:[#allocation10 + $0x80] sm:$0xff]  }
 0x135   :  { %1559 = vmatpush3.bf16.msra.mxu0 %v1765_v11  ;;  %1590 = vmatpush3.bf16.msra.mxu1 %v1780_v30 }
 0x136   :  { %1560 = vmatprep.subr.bf16.mxu0 %v1766_v12  ;;  %1591 = vmatprep.subr.bf16.mxu1 %v1930_v31 }
 0x137   :  { %1605 = vmatprep.mubr.msk.bf16.mxu1 %vm1931_vm1, %v1930_v31 }
 0x139   :  { %1561 = vmatpush3.bf16.msra.mxu0 %v1767_v13  ;;  %1592 = vmatpush3.bf16.msra.mxu1 %v1781_v32 }
 0x13a   :  { %1562 = vmatprep.subr.bf16.mxu0 %v1768_v17  ;;  %1593 = vmatprep.subr.bf16.mxu1 %v1930_v31 }
 0x13d   :  { %1563 = vmatpush3.bf16.msra.mxu0 %v1769_v19  ;;  %1594 = vmatpush3.bf16.msra.mxu1 %v1782_v33 }
 0x13e   :  { %1564 = vmatprep.subr.bf16.mxu0 %v1770_v20  ;;  %1595 = vmatprep.subr.bf16.mxu1 %v1930_v31 }
 0x141   :  { %1565 = vmatpush3.bf16.msra.mxu0 %v1771_v21  ;;  %1596 = vmatpush3.bf16.msra.mxu1 %v1783_v34 }
 0x142   :  { %1566 = vmatprep.subr.bf16.mxu0 %v1772_v22  ;;  %1597 = vmatprep.subr.bf16.mxu1 %v1930_v31 }
 0x145   :  { %1567 = vmatpush3.bf16.msra.mxu0 %v1773_v23  ;;  %1598 = vmatpush3.bf16.msra.mxu1 %v1784_v35 }
 0x146   :  { %1568 = vmatprep.subr.bf16.mxu0 %v1774_v24  ;;  %1599 = vmatprep.subr.bf16.mxu1 %v1930_v31 }
 0x149   :  { %1569 = vmatpush3.bf16.msra.mxu0 %v1775_v25  ;;  %1600 = vmatpush3.bf16.msra.mxu1 %v1785_v36 }
 0x14a   :  { %1570 = vmatprep.subr.bf16.mxu0 %v1776_v26  ;;  %1601 = vmatprep.subr.bf16.mxu1 %v1930_v31 }
 0x14d   :  { %1571 = vmatpush3.bf16.msra.mxu0 %v1777_v27  ;;  %1602 = vmatpush3.bf16.msra.mxu1 %v1786_v37 }
 0x14e   :  { %1572 = vmatprep.subr.bf16.mxu0 %v1778_v28  ;;  %1603 = vmatprep.subr.bf16.mxu1 %v1930_v31 }
 0x151   :  { %1573 = vmatpush3.bf16.msra.mxu0 %v1779_v29  ;;  %1604 = vmatpush3.bf16.msra.mxu1 %v1787_v38 }
 0x1d4   :  { %v949_v42 = vpop.f32.mrf.mxu0  ;;  %v990_v43 = vpop.f32.mrf.mxu1 }
 0x1d5   :  { %v950_v44 = vadd.f32 %v949_v42, %v391_v40 }
 0x1d6   :  { %v951_v45 = vpop.f32.mrf.mxu0  ;;  %v992_v46 = vpop.f32.mrf.mxu1 }
 0x1d7   :  { %v991_v47 = vadd.f32 %v990_v43, %v950_v44  ;;  %v952_v48 = vadd.f32 %v951_v45, %v395_v41 }
 0x1d8   :  { %v953_v49 = vpop.f32.mrf.mxu0  ;;  %v994_v50 = vpop.f32.mrf.mxu1 }
 0x1d9   :  { %v993_v51 = vadd.f32 %v992_v46, %v952_v48  ;;  %v1077_v52 = vmax.f32 %v991_v47, 0.0 }
 0x1da   :  { %v954_v53 = vpop.f32.mrf.mxu0  ;;  %v995_v54 = vpop.f32.mrf.mxu1 }
 0x1db   :  { %v1078_v55 = vmax.f32 %v993_v51, 0.0  ;;  %v1080_v57 = vpack.c.bf16 %v1077_v52, %v1077_v52 }
 0x1dd   :  { %v1081_v56 = vpack.c.bf16 %v1078_v55, %v1078_v55 }
 0x1df   :  { %1314 = vmatprep.mubr.bf16.mxu0 %v1081_v56 }
 0x1e0   :  { %1315 = vmatmul.mubr.bf16.vlgmr.msra.gmra.mxu0 %v1080_v57 }
 0x1f4   :  { %v1530_v15 = vpop.f32.mrf.mxu0  ;;  %v1552_v18 = vpop.f32.mrf.mxu1 }
 0x1f6   :  { %v1531_v59 = vpop.f32.mrf.mxu0  ;;  %v1553_v60 = vpop.f32.mrf.mxu1 }
 0x1f7   :  { %v1532_v61 = vadd.f32 %v1531_v59, %v1530_v15  ;;  %v1554_v1 = vadd.f32 %v1553_v60, %v1552_v18 }
 0x1f8   :  { %v1533_v62 = vpop.f32.mrf.mxu0  ;;  %v1555_v63 = vpop.f32.mrf.mxu1 }
 0x1f9   :  { %v1032_v0 = vadd.f32 %v1532_v61, %v399_v58 }
 0x1fa   :  { %v1534_v2 = vpop.f32.mrf.mxu0  ;;  %v1556_v3 = vpop.f32.mrf.mxu1 }
 0x1fb   :  { %v1072_v4 = vadd.f32 %v1554_v1, %v1032_v0 }
 0x1fd   :  { %v1079_v5 = vmax.f32 %v1072_v4, 0.0 }
 0x1ff   :  { %v1082_v6 = vpack.c.bf16 %v1079_v5, %v1079_v5 }
 0x201   :  { %1606 = vmatmul.mubr.bf16.vlgmr.msra.gmra.mxu1 %v1082_v6 }
 0x2a0   :  { %v1574_v7 = vpop.f32.mrf.mxu0 }
 0x2a2   :  { %v1575_v8 = vpop.f32.mrf.mxu0 }
 0x2a3   :  { %v1576_v11 = vadd.f32 %v1575_v8, %v1574_v7 }
 0x2a4   :  { %v1577_v9 = vpop.f32.mrf.mxu0 }
 0x2a5   :  { %v1317_v16 = vadd.f32 %v1576_v11, %v1489_v14 }
 0x2a6   :  { %v1578_v10 = vpop.f32.mrf.mxu0 }
 0x2c1   :  { %v1356_v12 = vpop.f32.mrf.mxu1 }
 0x2c2   :  { %v1357_v13 = vadd.f32 %v1356_v12, %v1317_v16 }
 0x2c3   :  { %v1607_v17 = vpop.f32.mrf.mxu1 }
 0x2c4   :  { %1788 = vtanh.f32 %v1357_v13 }
 0x2c5   :  { %v1359_v19 = vpop.f32.mrf.mxu1 }
 0x2c7   :  { %v1608_v20 = vpop.f32.mrf.mxu1 }
 0x2d1   :  { %v1789_v21 = vpop.eup %1788 }
 0x2d2   :  { %v1363_v22 = vmul.f32 2.0, %v1789_v21 }
 0x2d4   :  { %1365 = vst.msk [vmem:[#allocation11] sm:$0xff] %vm1364_vm2, %v1363_v22 }
 0x2d5   :  { %1901 = shalt.err (!%p1898_p1)
}
 0x2d6   :  { %1375 = dma.vmem_to_hbm [thread:$0]  %s1373_s8, 128, %s2030_s7, [#allocation4]  }
 0x2d7   :  { %1916 = dma.done.wait [#allocation4], 128  }
 0x2d8   :  { %1917 = vsyncadd [#allocation4], 4294967168 }
 0x2d9   :  { %1379 = vsyncpa [#allocation3], 1 }
 0x2da   :  { %1380 = vsyncpa [#allocation6], 1 }
 0x2db   :  { %1381 = vsyncpa [#allocation9], 1 }
 0x2dc   :  { %1382 = vsyncpa [#allocation4], 1 }

</bundles_post_ra>
